<compile_context>
chip_gen: v5e
topology: v5e:2x2
jax: 0.10.0
libtpu: 0.0.40
codegen_flags: <defaults>
</compile_context>

<pallas_src>
import functools

import jax
import jax.numpy as jnp
from jax import lax
from jax.experimental import pallas as pl
from jax.experimental.pallas import tpu as pltpu
import numpy as np

MIN_EXPERT_CAPACITY = 4


def _top2_gating_kernel(x_ref, w_ref, sl_ref, *rest,
                        policy, threshold, eps, capacity, groups):
    # Block shapes:
    #   x_ref       : (G, N, D)   tokens of the current G groups
    #   w_ref       : (D, E)      gating weight (resident across the grid)
    #   sl_ref      : (N, N)      strictly-lower-triangular 0/1 mask, bf16 (resident)
    #   probs_ref   : (G, N, 1)   uniform(0,1) samples (only when policy=='random')
    #   dispatch_ref: (G, N, ECp) ECp = E*C padded to a multiple of 128
    #   combine_ref : (G, N, ECp)
    #   loss_ref    : (G, 1, E)   per-group density_proxy * density
    if policy == 'random':
        probs_ref, dispatch_ref, combine_ref, loss_ref = rest
    else:
        probs_ref = None
        dispatch_ref, combine_ref, loss_ref = rest

    G = groups
    N = x_ref.shape[1]
    D = x_ref.shape[2]
    E = w_ref.shape[1]
    C = capacity
    ECp = combine_ref.shape[2]
    cap_f = float(C)

    # ---- gating logits + softmax for all G groups at once (MXU) ----
    x = x_ref[...].reshape(G * N, D).astype(jnp.float32)    # (G*N, D)
    w = w_ref[...].astype(jnp.float32)                       # (D, E)
    logits = jnp.dot(x, w, precision=lax.Precision.HIGHEST,
                     preferred_element_type=jnp.float32)     # (G*N, E)
    logits = logits - jnp.max(logits, axis=-1, keepdims=True)
    exp_l = jnp.exp(logits)
    raw_gates_all = exp_l / jnp.sum(exp_l, axis=-1, keepdims=True)

    sl = sl_ref[...]                                          # (N, N) bf16, resident
    eidx = lax.broadcasted_iota(jnp.int32, (N, E), 1).astype(jnp.float32)

    # ---- lane-column decomposition of the (E*C) slab: (1, ECp) row vectors ----
    colf = lax.broadcasted_iota(jnp.int32, (1, ECp), 1).astype(jnp.float32)
    e_col = jnp.floor((colf + 0.5) * (1.0 / float(C)))        # exact col // C
    c_col = colf - e_col * float(C)                           # exact col %  C

    inv_thr = 1.0 / float(max(threshold, eps))

    for g in range(G):                                        # static unroll (G small)
        raw_gates = raw_gates_all[g * N:(g + 1) * N]          # (N, E)

        # ---- top-1 ----
        gate_1 = jnp.max(raw_gates, axis=-1, keepdims=True)
        index_1 = jnp.min(jnp.where(raw_gates >= gate_1, eidx, float(E)),
                          axis=-1, keepdims=True)             # first argmax
        oh_1 = (eidx == index_1).astype(jnp.float32)

        # ---- top-2 = top-1 with the winner removed ----
        gates_wo1 = raw_gates * (1.0 - oh_1)
        gate_2 = jnp.max(gates_wo1, axis=-1, keepdims=True)
        index_2 = jnp.min(jnp.where(gates_wo1 >= gate_2, eidx, float(E)),
                          axis=-1, keepdims=True)
        oh_2 = (eidx == index_2).astype(jnp.float32)

        # ---- load-balancing loss contribution (per group) ----
        density_1 = jnp.mean(oh_1, axis=0, keepdims=True)             # (1, E)
        density_1_proxy = jnp.mean(raw_gates, axis=0, keepdims=True)  # (1, E)
        loss_ref[g] = density_1_proxy * density_1

        # ---- normalize the two gates (reciprocal + multiply) ----
        inv_denom = pl.reciprocal(gate_1 + gate_2 + eps)
        gate_1 = gate_1 * inv_denom
        gate_2 = gate_2 * inv_denom

        mask_2 = oh_2

        # ---- second-expert policy ----
        if policy == 'all':
            pass
        elif policy == 'none':
            mask_2 = jnp.zeros_like(mask_2)
        elif policy == 'threshold':
            mask_2 = mask_2 * (gate_2 > threshold).astype(jnp.float32)
        elif policy == 'random':
            probs = probs_ref[g].astype(jnp.float32)                  # (N, 1)
            keep = (probs < gate_2 * inv_thr).astype(jnp.float32)
            mask_2 = mask_2 * keep
        else:
            raise ValueError(f'Unknown policy {policy}')

        # ---- fused exclusive cumsums: one bf16 matmul, f32 accumulation ----
        rhs = jnp.concatenate([oh_1, mask_2], axis=-1).astype(jnp.bfloat16)  # (N, 2E)
        pos = jnp.dot(sl, rhs, preferred_element_type=jnp.float32)           # (N, 2E)

        pos_1 = pos[:, :E] * oh_1                                     # (N, E)
        mask_1 = oh_1 * (pos_1 < cap_f).astype(jnp.float32)
        mask_1_count = jnp.sum(mask_1, axis=0, keepdims=True)         # (1, E)
        mask_1_flat = jnp.sum(mask_1, axis=-1, keepdims=True)         # (N, 1)
        pos_1_s = jnp.sum(pos_1, axis=-1, keepdims=True)              # (N, 1)
        gate_1 = gate_1 * mask_1_flat

        pos_2 = (pos[:, E:] + mask_1_count) * mask_2
        mask_2 = mask_2 * (pos_2 < cap_f).astype(jnp.float32)
        mask_2_flat = jnp.sum(mask_2, axis=-1, keepdims=True)         # (N, 1)
        pos_2_s = jnp.sum(pos_2, axis=-1, keepdims=True)              # (N, 1)
        gate_2 = gate_2 * mask_2_flat

        # ---- combine/dispatch slab (N, ECp); padded columns (e_col >= E) are 0 ----
        sel_1 = (e_col == index_1) & (c_col == pos_1_s)               # (N, ECp)
        sel_2 = (e_col == index_2) & (c_col == pos_2_s)
        combine = (jnp.where(sel_1, gate_1 * mask_1_flat, 0.0)
                   + jnp.where(sel_2, gate_2 * mask_2_flat, 0.0))     # (N, ECp)

        combine_ref[g] = combine.astype(combine_ref.dtype)
        dispatch_ref[g] = (combine != 0.0).astype(dispatch_ref.dtype)


def top2_gating(x, w_gating, probs=None, *, policy='random', threshold=0.2,
                capacity_factor=2.0, eps=1e-9, importance=None):
    """Top-2 gating forward.

    x: (B, N, D) tokens grouped per expert-group (native dtype), w_gating: (D, E).
    probs: (B, N) uniform(0,1) samples, required for policy=='random'.
    Returns (dispatch_tensor (B,N,E,C), combine_tensor (B,N,E,C), loss scalar).
    """
    # TODO(synk): importance masking path not implemented (module default importance=None).
    assert importance is None, "importance masking not implemented"
    B, N, D = x.shape
    Dw, E = w_gating.shape
    assert Dw == D

    expert_capacity = min(N, int(N * capacity_factor / E))
    expert_capacity = max(expert_capacity, MIN_EXPERT_CAPACITY)
    C = int(expert_capacity)
    EC = E * C
    ECp = ((EC + 127) // 128) * 128            # lane-dense (unmasked vst) output slab

    # Batch G groups per grid step when N is small (amortize per-step overhead,
    # fill MXU sublanes). Kept to N % 8 == 0 so the in-kernel reshape is free.
    # TODO(synk): also batch groups when N % 8 != 0 (needs a relayout-safe path).
    if N >= 256 or N % 8 != 0:
        G = 1
    else:
        G = 1
        for cand in range(1, B + 1):
            if B % cand == 0 and cand * N <= 512:
                G = cand
    n_steps = B // G

    # strictly-lower-triangular 0/1 mask, built ONCE, resident in VMEM (bf16).
    sl = (jnp.arange(N, dtype=jnp.int32)[None, :]
          < jnp.arange(N, dtype=jnp.int32)[:, None]).astype(jnp.bfloat16)

    kernel = functools.partial(_top2_gating_kernel, policy=policy,
                               threshold=float(threshold), eps=float(eps),
                               capacity=C, groups=G)

    inputs = [x, w_gating, sl]
    in_specs = [
        pl.BlockSpec((G, N, D), lambda b: (b, 0, 0)),
        pl.BlockSpec((D, E), lambda b: (0, 0)),    # constant index -> stays resident
        pl.BlockSpec((N, N), lambda b: (0, 0)),    # constant index -> stays resident
    ]
    if policy == 'random':
        if probs is None:
            probs = jnp.zeros((B, N), dtype=jnp.float32)
        probs3 = probs.reshape(B, N, 1).astype(jnp.float32)
        inputs.append(probs3)
        in_specs.append(pl.BlockSpec((G, N, 1), lambda b: (b, 0, 0)))

    # Advisory cost for XLA scheduling around the MoE graph.
    flops = int(2 * B * N * D * E          # gating matmul
                + 2 * B * N * N * (2 * E)) # fused triangular cumsum matmul
    bytes_accessed = int(x.size * x.dtype.itemsize
                         + w_gating.size * w_gating.dtype.itemsize
                         + N * N * 2
                         + (B * N * 4 if policy == 'random' else 0)
                         + 2 * B * N * ECp * 4 + B * E * 4)
    cost = pl.CostEstimate(flops=flops, transcendentals=int(B * N * E),
                           bytes_accessed=bytes_accessed)

    # Explicit scoped-VMEM budget: double-buffered in/out tiles + headroom,
    # clamped below v7x's 64 MiB physical VMEM.
    in_tile_bytes = (G * N * D * x.dtype.itemsize
                     + D * E * w_gating.dtype.itemsize
                     + N * N * 2
                     + (G * N * 4 if policy == 'random' else 0))
    out_tile_bytes = 2 * G * N * ECp * 4 + G * E * 4
    est = 2 * (in_tile_bytes + out_tile_bytes)          # double-buffering
    vmem_limit = int(min(max(2 * est + (8 << 20), 32 << 20), 56 << 20))

    dispatch_flat, combine_flat, loss_parts = pl.pallas_call(
        kernel,
        out_shape=(
            jax.ShapeDtypeStruct((B, N, ECp), jnp.float32),   # dispatch
            jax.ShapeDtypeStruct((B, N, ECp), jnp.float32),   # combine
            jax.ShapeDtypeStruct((B, 1, E), jnp.float32),     # per-group loss parts
        ),
        grid_spec=pltpu.PrefetchScalarGridSpec(
            num_scalar_prefetch=0,
            grid=(n_steps,),
            in_specs=in_specs,
            out_specs=(
                pl.BlockSpec((G, N, ECp), lambda b: (b, 0, 0)),
                pl.BlockSpec((G, N, ECp), lambda b: (b, 0, 0)),
                pl.BlockSpec((G, 1, E), lambda b: (b, 0, 0)),
            ),
        ),
        compiler_params=pltpu.CompilerParams(
            dimension_semantics=("parallel",),
            vmem_limit_bytes=vmem_limit),
        cost_estimate=cost,
    )(*inputs)

    dispatch = dispatch_flat[:, :, :EC].reshape(B, N, E, C)
    combine = combine_flat[:, :, :EC].reshape(B, N, E, C)
    loss = jnp.mean(loss_parts) * float(E ** 2)
    return dispatch, combine, loss


# ---------------- pure-JAX reference (direct transcription of the torch code) -------------


def _cumsum_exclusive(t, axis=-2):
    return jnp.cumsum(t, axis=axis) - t


def top2_gating_reference(x, w_gating, probs, *, policy='random', threshold=0.2,
                          capacity_factor=2.0, eps=1e-9):
    B, N, D = x.shape
    E = w_gating.shape[-1]

    raw_gates = jnp.einsum('bnd,de->bne', x, w_gating,
                           precision=lax.Precision.HIGHEST)
    raw_gates = jax.nn.softmax(raw_gates, axis=-1)

    gate_1 = jnp.max(raw_gates, axis=-1)
    index_1 = jnp.argmax(raw_gates, axis=-1)
    mask_1 = jax.nn.one_hot(index_1, E, dtype=jnp.float32)
    density_1_proxy = raw_gates

    gates_without_top_1 = raw_gates * (1.0 - mask_1)
    gate_2 = jnp.max(gates_without_top_1, axis=-1)
    index_2 = jnp.argmax(gates_without_top_1, axis=-1)
    mask_2 = jax.nn.one_hot(index_2, E, dtype=jnp.float32)

    denom = gate_1 + gate_2 + eps
    gate_1 = gate_1 / denom
    gate_2 = gate_2 / denom

    density_1 = jnp.mean(mask_1, axis=-2)
    density_1_proxy = jnp.mean(density_1_proxy, axis=-2)
    loss = jnp.mean(density_1_proxy * density_1) * float(E ** 2)

    if policy == 'all':
        pass
    elif policy == 'none':
        mask_2 = jnp.zeros_like(mask_2)
    elif policy == 'threshold':
        mask_2 = mask_2 * (gate_2 > threshold).astype(jnp.float32)[..., None]
    elif policy == 'random':
        keep = (probs < gate_2 / float(max(threshold, eps))).astype(jnp.float32)
        mask_2 = mask_2 * keep[..., None]
    else:
        raise ValueError(policy)

    expert_capacity = min(N, int(N * capacity_factor / E))
    expert_capacity = max(expert_capacity, MIN_EXPERT_CAPACITY)
    cap_f = float(expert_capacity)

    position_in_expert_1 = _cumsum_exclusive(mask_1, axis=-2) * mask_1
    mask_1 = mask_1 * (position_in_expert_1 < cap_f).astype(jnp.float32)
    mask_1_count = jnp.sum(mask_1, axis=-2, keepdims=True)
    mask_1_flat = jnp.sum(mask_1, axis=-1)
    position_in_expert_1 = jnp.sum(position_in_expert_1, axis=-1)
    gate_1 = gate_1 * mask_1_flat

    position_in_expert_2 = _cumsum_exclusive(mask_2, axis=-2) + mask_1_count
    position_in_expert_2 = position_in_expert_2 * mask_2
    mask_2 = mask_2 * (position_in_expert_2 < cap_f).astype(jnp.float32)
    mask_2_flat = jnp.sum(mask_2, axis=-1)
    position_in_expert_2 = jnp.sum(position_in_expert_2, axis=-1)
    gate_2 = gate_2 * mask_2_flat

    combine = (gate_1[..., None, None] * mask_1_flat[..., None, None]
               * jax.nn.one_hot(index_1, E, dtype=jnp.float32)[..., None]
               * jax.nn.one_hot(position_in_expert_1.astype(jnp.int32),
                                expert_capacity, dtype=jnp.float32)[..., None, :]
               + gate_2[..., None, None] * mask_2_flat[..., None, None]
               * jax.nn.one_hot(index_2, E, dtype=jnp.float32)[..., None]
               * jax.nn.one_hot(position_in_expert_2.astype(jnp.int32),
                                expert_capacity, dtype=jnp.float32)[..., None, :])
    dispatch = (combine != 0).astype(combine.dtype)
    return dispatch, combine, loss


if __name__ == "__main__":
    key = jax.random.PRNGKey(0)
    kx, kw, kp = jax.random.split(key, 3)

    # Small shapes: groups=2, tokens-per-group=8, dim=32, num_gates(experts)=4
    B, N, D, E = 2, 8, 32, 4
    threshold = 0.2
    capacity_factor = 2.0     # eval-mode default of the torch module

    x = jax.random.normal(kx, (B, N, D), dtype=jnp.float32)
    w_gating = jax.random.normal(kw, (D, E), dtype=jnp.float32)   # torch.randn init
    probs = jax.random.uniform(kp, (B, N), dtype=jnp.float32)     # 'random' policy draws

    C = max(min(N, int(N * capacity_factor / E)), MIN_EXPERT_CAPACITY)

    # --- policy='random' (eval-mode default), probs passed explicitly ---
    dispatch, combine, loss = top2_gating(
        x, w_gating, probs, policy='random', threshold=threshold,
        capacity_factor=capacity_factor)
    dispatch, combine, loss = jax.block_until_ready((dispatch, combine, loss))

    d_ref, c_ref, l_ref = top2_gating_reference(
        x, w_gating, probs, policy='random', threshold=threshold,
        capacity_factor=capacity_factor)

    assert dispatch.shape == (B, N, E, C) and combine.shape == (B, N, E, C)
    np.testing.assert_allclose(np.asarray(combine), np.asarray(c_ref),
                               rtol=1e-4, atol=1e-5)
    np.testing.assert_allclose(np.asarray(dispatch), np.asarray(d_ref),
                               rtol=0, atol=1e-6)
    np.testing.assert_allclose(float(loss), float(l_ref), rtol=1e-4, atol=1e-6)

    # --- policy='all' exercises the no-probs (no extra DMA) code path ---
    d2, c2, l2 = top2_gating(
        x, w_gating, None, policy='all', threshold=threshold,
        capacity_factor=capacity_factor)
    d2, c2, l2 = jax.block_until_ready((d2, c2, l2))
    d2_ref, c2_ref, l2_ref = top2_gating_reference(
        x, w_gating, None, policy='all', threshold=threshold,
        capacity_factor=capacity_factor)
    np.testing.assert_allclose(np.asarray(c2), np.asarray(c2_ref),
                               rtol=1e-4, atol=1e-5)
    np.testing.assert_allclose(np.asarray(d2), np.asarray(d2_ref),
                               rtol=0, atol=1e-6)
    np.testing.assert_allclose(float(l2), float(l2_ref), rtol=1e-4, atol=1e-6)

    print("KERNEL_OK")
</pallas_src>

<mosaic_0001>
module attributes {stable_mosaic.version = 11 : i64} {
  func.func @_top2_gating_kernel(%arg0: i32, %arg1: memref<2x8x32xf32, #tpu.memory_space<vmem>>, %arg2: memref<32x4xf32, #tpu.memory_space<vmem>>, %arg3: memref<8x8xbf16, #tpu.memory_space<vmem>>, %arg4: memref<2x8x1xf32, #tpu.memory_space<vmem>>, %arg5: memref<2x8x128xf32, #tpu.memory_space<vmem>>, %arg6: memref<2x8x128xf32, #tpu.memory_space<vmem>>, %arg7: memref<2x1x4xf32, #tpu.memory_space<vmem>>) attributes {dimension_semantics = [#tpu.dimension_semantics<parallel>], iteration_bounds = array<i64: 1>, scalar_prefetch = 0 : i64, scratch_operands = 0 : i64, tpu.core_type = #tpu.core_type<tc>, window_params = [{transform_indices = @transform_0, window_bounds = array<i64: 2, 8, 32>}, {pipeline_mode = #tpu.pipeline_mode<synchronous>, transform_indices = @transform_1, window_bounds = array<i64: 32, 4>}, {pipeline_mode = #tpu.pipeline_mode<synchronous>, transform_indices = @transform_2, window_bounds = array<i64: 8, 8>}, {transform_indices = @transform_3, window_bounds = array<i64: 2, 8, 1>}, {transform_indices = @transform_4, window_bounds = array<i64: 2, 8, 128>}, {transform_indices = @transform_5, window_bounds = array<i64: 2, 8, 128>}, {transform_indices = @transform_6, window_bounds = array<i64: 2, 1, 4>}]} {
    %c0 = arith.constant 0 : index
    %c0_0 = arith.constant 0 : index
    %c0_1 = arith.constant 0 : index
    %0 = vector.load %arg1[%c0, %c0_0, %c0_1] : memref<2x8x32xf32, #tpu.memory_space<vmem>>, vector<2x8x32xf32>
    %1 = vector.shape_cast %0 : vector<2x8x32xf32> to vector<16x32xf32>
    %c0_2 = arith.constant 0 : index
    %c0_3 = arith.constant 0 : index
    %2 = vector.load %arg2[%c0_2, %c0_3] : memref<32x4xf32, #tpu.memory_space<vmem>>, vector<32x4xf32>
    %cst = arith.constant dense<0.000000e+00> : vector<16x4xf32>
    %3 = tpu.matmul %1, %2, %cst {dimension_numbers = #tpu.dot_dimension_numbers<[1], [0], [0], [1], [0, 0, 1, 1], [], []>, precision = #tpu.contract_precision<fp32>} : vector<16x32xf32>, vector<32x4xf32>, vector<16x4xf32> -> vector<16x4xf32>
    %cst_4 = arith.constant dense<0xFF800000> : vector<16xf32>
    %4 = vector.multi_reduction <maximumf>, %3, %cst_4 [1] : vector<16x4xf32> to vector<16xf32>
    %5 = vector.shape_cast %4 : vector<16xf32> to vector<16x1xf32>
    %6 = vector.broadcast %5 : vector<16x1xf32> to vector<16x4xf32>
    %7 = arith.subf %3, %6 : vector<16x4xf32>
    %8 = math.exp %7 : vector<16x4xf32>
    %cst_5 = arith.constant dense<0.000000e+00> : vector<16xf32>
    %9 = vector.multi_reduction <add>, %8, %cst_5 [1] : vector<16x4xf32> to vector<16xf32>
    %10 = vector.shape_cast %9 : vector<16xf32> to vector<16x1xf32>
    %11 = vector.broadcast %10 : vector<16x1xf32> to vector<16x4xf32>
    %12 = arith.divf %8, %11 : vector<16x4xf32>
    %c0_6 = arith.constant 0 : index
    %c0_7 = arith.constant 0 : index
    %13 = vector.load %arg3[%c0_6, %c0_7] : memref<8x8xbf16, #tpu.memory_space<vmem>>, vector<8x8xbf16>
    %14 = tpu.iota {dimensions = array<i32: 1>} : vector<8x4xi32>
    %15 = arith.sitofp %14 : vector<8x4xi32> to vector<8x4xf32>
    %16 = tpu.iota {dimensions = array<i32: 1>} : vector<1x128xi32>
    %17 = arith.sitofp %16 : vector<1x128xi32> to vector<1x128xf32>
    %cst_8 = arith.constant 5.000000e-01 : f32
    %18 = vector.broadcast %cst_8 : f32 to vector<1x128xf32>
    %19 = arith.addf %17, %18 : vector<1x128xf32>
    %cst_9 = arith.constant 2.500000e-01 : f32
    %20 = vector.broadcast %cst_9 : f32 to vector<1x128xf32>
    %21 = arith.mulf %19, %20 : vector<1x128xf32>
    %22 = math.floor %21 : vector<1x128xf32>
    %cst_10 = arith.constant 4.000000e+00 : f32
    %23 = vector.broadcast %cst_10 : f32 to vector<1x128xf32>
    %24 = arith.mulf %22, %23 : vector<1x128xf32>
    %25 = arith.subf %17, %24 : vector<1x128xf32>
    %26 = vector.extract_strided_slice %12 {offsets = [0, 0], sizes = [8, 4], strides = [1, 1]} : vector<16x4xf32> to vector<8x4xf32>
    %cst_11 = arith.constant dense<0xFF800000> : vector<8xf32>
    %27 = vector.multi_reduction <maximumf>, %26, %cst_11 [1] : vector<8x4xf32> to vector<8xf32>
    %28 = vector.shape_cast %27 : vector<8xf32> to vector<8x1xf32>
    %29 = vector.broadcast %28 : vector<8x1xf32> to vector<8x4xf32>
    %30 = arith.cmpf oge, %26, %29 : vector<8x4xf32>
    %cst_12 = arith.constant 4.000000e+00 : f32
    %31 = vector.broadcast %cst_12 : f32 to vector<8x4xf32>
    %32 = arith.select %30, %15, %31 : vector<8x4xi1>, vector<8x4xf32>
    %cst_13 = arith.constant dense<0x7F800000> : vector<8xf32>
    %33 = vector.multi_reduction <minimumf>, %32, %cst_13 [1] : vector<8x4xf32> to vector<8xf32>
    %34 = vector.shape_cast %33 : vector<8xf32> to vector<8x1xf32>
    %35 = vector.broadcast %34 : vector<8x1xf32> to vector<8x4xf32>
    %36 = arith.cmpf oeq, %15, %35 : vector<8x4xf32>
    %37 = arith.extui %36 : vector<8x4xi1> to vector<8x4xi32>
    %38 = arith.sitofp %37 : vector<8x4xi32> to vector<8x4xf32>
    %cst_14 = arith.constant 1.000000e+00 : f32
    %39 = vector.broadcast %cst_14 : f32 to vector<8x4xf32>
    %40 = arith.subf %39, %38 : vector<8x4xf32>
    %41 = arith.mulf %26, %40 : vector<8x4xf32>
    %cst_15 = arith.constant dense<0xFF800000> : vector<8xf32>
    %42 = vector.multi_reduction <maximumf>, %41, %cst_15 [1] : vector<8x4xf32> to vector<8xf32>
    %43 = vector.shape_cast %42 : vector<8xf32> to vector<8x1xf32>
    %44 = vector.broadcast %43 : vector<8x1xf32> to vector<8x4xf32>
    %45 = arith.cmpf oge, %41, %44 : vector<8x4xf32>
    %cst_16 = arith.constant 4.000000e+00 : f32
    %46 = vector.broadcast %cst_16 : f32 to vector<8x4xf32>
    %47 = arith.select %45, %15, %46 : vector<8x4xi1>, vector<8x4xf32>
    %cst_17 = arith.constant dense<0x7F800000> : vector<8xf32>
    %48 = vector.multi_reduction <minimumf>, %47, %cst_17 [1] : vector<8x4xf32> to vector<8xf32>
    %49 = vector.shape_cast %48 : vector<8xf32> to vector<8x1xf32>
    %50 = vector.broadcast %49 : vector<8x1xf32> to vector<8x4xf32>
    %51 = arith.cmpf oeq, %15, %50 : vector<8x4xf32>
    %52 = arith.extui %51 : vector<8x4xi1> to vector<8x4xi32>
    %53 = arith.sitofp %52 : vector<8x4xi32> to vector<8x4xf32>
    %cst_18 = arith.constant dense<0.000000e+00> : vector<4xf32>
    %54 = vector.multi_reduction <add>, %38, %cst_18 [0] : vector<8x4xf32> to vector<4xf32>
    %55 = vector.shape_cast %54 : vector<4xf32> to vector<1x4xf32>
    %cst_19 = arith.constant 8.000000e+00 : f32
    %56 = vector.broadcast %cst_19 : f32 to vector<1x4xf32>
    %57 = arith.divf %55, %56 : vector<1x4xf32>
    %cst_20 = arith.constant dense<0.000000e+00> : vector<4xf32>
    %58 = vector.multi_reduction <add>, %26, %cst_20 [0] : vector<8x4xf32> to vector<4xf32>
    %59 = vector.shape_cast %58 : vector<4xf32> to vector<1x4xf32>
    %cst_21 = arith.constant 8.000000e+00 : f32
    %60 = vector.broadcast %cst_21 : f32 to vector<1x4xf32>
    %61 = arith.divf %59, %60 : vector<1x4xf32>
    %62 = arith.mulf %61, %57 : vector<1x4xf32>
    %c0_22 = arith.constant 0 : index
    %c0_23 = arith.constant 0 : index
    %c0_24 = arith.constant 0 : index
    %63 = vector.load %arg7[%c0_22, %c0_23, %c0_24] : memref<2x1x4xf32, #tpu.memory_space<vmem>>, vector<1x1x4xf32>
    %64 = vector.shape_cast %63 : vector<1x1x4xf32> to vector<1x4xf32>
    %65 = vector.shape_cast %62 : vector<1x4xf32> to vector<1x1x4xf32>
    tpu.vector_store %arg7[%c0_22, %c0_23, %c0_24], %65 {strides = array<i32>} : memref<2x1x4xf32, #tpu.memory_space<vmem>>, vector<1x1x4xf32>,
    %66 = arith.addf %28, %43 : vector<8x1xf32>
    %cst_25 = arith.constant 9.99999971E-10 : f32
    %67 = vector.broadcast %cst_25 : f32 to vector<8x1xf32>
    %68 = arith.addf %66, %67 : vector<8x1xf32>
    %69 = tpu.reciprocal %68 : vector<8x1xf32> -> vector<8x1xf32>
    %70 = arith.mulf %28, %69 : vector<8x1xf32>
    %71 = arith.mulf %43, %69 : vector<8x1xf32>
    %c0_26 = arith.constant 0 : index
    %c0_27 = arith.constant 0 : index
    %c0_28 = arith.constant 0 : index
    %72 = vector.load %arg4[%c0_26, %c0_27, %c0_28] : memref<2x8x1xf32, #tpu.memory_space<vmem>>, vector<1x8x1xf32>
    %73 = vector.shape_cast %72 : vector<1x8x1xf32> to vector<8x1xf32>
    %cst_29 = arith.constant 5.000000e+00 : f32
    %74 = vector.broadcast %cst_29 : f32 to vector<8x1xf32>
    %75 = arith.mulf %71, %74 : vector<8x1xf32>
    %76 = arith.cmpf olt, %73, %75 : vector<8x1xf32>
    %77 = arith.extui %76 : vector<8x1xi1> to vector<8x1xi32>
    %78 = arith.sitofp %77 : vector<8x1xi32> to vector<8x1xf32>
    %79 = vector.broadcast %78 : vector<8x1xf32> to vector<8x4xf32>
    %80 = arith.mulf %53, %79 : vector<8x4xf32>
    %81 = tpu.concatenate %38, %80 in 1 : vector<8x4xf32>, vector<8x4xf32> -> vector<8x8xf32>
    %82 = arith.truncf %81 : vector<8x8xf32> to vector<8x8xbf16>
    %cst_30 = arith.constant dense<0.000000e+00> : vector<8x8xf32>
    %83 = tpu.matmul %13, %82, %cst_30 {dimension_numbers = #tpu.dot_dimension_numbers<[1], [0], [0], [1], [0, 0, 1, 1], [], []>} : vector<8x8xbf16>, vector<8x8xbf16>, vector<8x8xf32> -> vector<8x8xf32>
    %84 = vector.extract_strided_slice %83 {offsets = [0, 0], sizes = [8, 4], strides = [1, 1]} : vector<8x8xf32> to vector<8x4xf32>
    %85 = arith.mulf %84, %38 : vector<8x4xf32>
    %cst_31 = arith.constant 4.000000e+00 : f32
    %86 = vector.broadcast %cst_31 : f32 to vector<8x4xf32>
    %87 = arith.cmpf olt, %85, %86 : vector<8x4xf32>
    %88 = arith.extui %87 : vector<8x4xi1> to vector<8x4xi32>
    %89 = arith.sitofp %88 : vector<8x4xi32> to vector<8x4xf32>
    %90 = arith.mulf %38, %89 : vector<8x4xf32>
    %cst_32 = arith.constant dense<0.000000e+00> : vector<4xf32>
    %91 = vector.multi_reduction <add>, %90, %cst_32 [0] : vector<8x4xf32> to vector<4xf32>
    %92 = vector.shape_cast %91 : vector<4xf32> to vector<1x4xf32>
    %cst_33 = arith.constant dense<0.000000e+00> : vector<8xf32>
    %93 = vector.multi_reduction <add>, %90, %cst_33 [1] : vector<8x4xf32> to vector<8xf32>
    %94 = vector.shape_cast %93 : vector<8xf32> to vector<8x1xf32>
    %cst_34 = arith.constant dense<0.000000e+00> : vector<8xf32>
    %95 = vector.multi_reduction <add>, %85, %cst_34 [1] : vector<8x4xf32> to vector<8xf32>
    %96 = vector.shape_cast %95 : vector<8xf32> to vector<8x1xf32>
    %97 = arith.mulf %70, %94 : vector<8x1xf32>
    %98 = vector.extract_strided_slice %83 {offsets = [0, 4], sizes = [8, 4], strides = [1, 1]} : vector<8x8xf32> to vector<8x4xf32>
    %99 = vector.broadcast %92 : vector<1x4xf32> to vector<8x4xf32>
    %100 = arith.addf %98, %99 : vector<8x4xf32>
    %101 = arith.mulf %100, %80 : vector<8x4xf32>
    %cst_35 = arith.constant 4.000000e+00 : f32
    %102 = vector.broadcast %cst_35 : f32 to vector<8x4xf32>
    %103 = arith.cmpf olt, %101, %102 : vector<8x4xf32>
    %104 = arith.extui %103 : vector<8x4xi1> to vector<8x4xi32>
    %105 = arith.sitofp %104 : vector<8x4xi32> to vector<8x4xf32>
    %106 = arith.mulf %80, %105 : vector<8x4xf32>
    %cst_36 = arith.constant dense<0.000000e+00> : vector<8xf32>
    %107 = vector.multi_reduction <add>, %106, %cst_36 [1] : vector<8x4xf32> to vector<8xf32>
    %108 = vector.shape_cast %107 : vector<8xf32> to vector<8x1xf32>
    %cst_37 = arith.constant dense<0.000000e+00> : vector<8xf32>
    %109 = vector.multi_reduction <add>, %101, %cst_37 [1] : vector<8x4xf32> to vector<8xf32>
    %110 = vector.shape_cast %109 : vector<8xf32> to vector<8x1xf32>
    %111 = arith.mulf %71, %108 : vector<8x1xf32>
    %112 = vector.broadcast %22 : vector<1x128xf32> to vector<8x128xf32>
    %113 = vector.broadcast %34 : vector<8x1xf32> to vector<8x128xf32>
    %114 = arith.cmpf oeq, %112, %113 : vector<8x128xf32>
    %115 = vector.broadcast %25 : vector<1x128xf32> to vector<8x128xf32>
    %116 = vector.broadcast %96 : vector<8x1xf32> to vector<8x128xf32>
    %117 = arith.cmpf oeq, %115, %116 : vector<8x128xf32>
    %118 = arith.andi %114, %117 : vector<8x128xi1>
    %119 = vector.broadcast %22 : vector<1x128xf32> to vector<8x128xf32>
    %120 = vector.broadcast %49 : vector<8x1xf32> to vector<8x128xf32>
    %121 = arith.cmpf oeq, %119, %120 : vector<8x128xf32>
    %122 = vector.broadcast %25 : vector<1x128xf32> to vector<8x128xf32>
    %123 = vector.broadcast %110 : vector<8x1xf32> to vector<8x128xf32>
    %124 = arith.cmpf oeq, %122, %123 : vector<8x128xf32>
    %125 = arith.andi %121, %124 : vector<8x128xi1>
    %126 = arith.mulf %97, %94 : vector<8x1xf32>
    %cst_38 = arith.constant 0.000000e+00 : f32
    %127 = vector.shape_cast %126 : vector<8x1xf32> to vector<8x1xf32>
    %128 = vector.broadcast %127 : vector<8x1xf32> to vector<8x128xf32>
    %129 = vector.broadcast %cst_38 : f32 to vector<8x128xf32>
    %130 = arith.select %118, %128, %129 : vector<8x128xi1>, vector<8x128xf32>
    %131 = arith.mulf %111, %108 : vector<8x1xf32>
    %cst_39 = arith.constant 0.000000e+00 : f32
    %132 = vector.shape_cast %131 : vector<8x1xf32> to vector<8x1xf32>
    %133 = vector.broadcast %132 : vector<8x1xf32> to vector<8x128xf32>
    %134 = vector.broadcast %cst_39 : f32 to vector<8x128xf32>
    %135 = arith.select %125, %133, %134 : vector<8x128xi1>, vector<8x128xf32>
    %136 = arith.addf %130, %135 : vector<8x128xf32>
    %c0_40 = arith.constant 0 : index
    %c0_41 = arith.constant 0 : index
    %c0_42 = arith.constant 0 : index
    %137 = vector.load %arg6[%c0_40, %c0_41, %c0_42] : memref<2x8x128xf32, #tpu.memory_space<vmem>>, vector<1x8x128xf32>
    %138 = vector.shape_cast %137 : vector<1x8x128xf32> to vector<8x128xf32>
    %139 = vector.shape_cast %136 : vector<8x128xf32> to vector<1x8x128xf32>
    tpu.vector_store %arg6[%c0_40, %c0_41, %c0_42], %139 {strides = array<i32>} : memref<2x8x128xf32, #tpu.memory_space<vmem>>, vector<1x8x128xf32>,
    %cst_43 = arith.constant 0.000000e+00 : f32
    %140 = vector.broadcast %cst_43 : f32 to vector<8x128xf32>
    %141 = arith.cmpf one, %136, %140 : vector<8x128xf32>
    %142 = arith.extui %141 : vector<8x128xi1> to vector<8x128xi32>
    %143 = arith.sitofp %142 : vector<8x128xi32> to vector<8x128xf32>
    %c0_44 = arith.constant 0 : index
    %c0_45 = arith.constant 0 : index
    %c0_46 = arith.constant 0 : index
    %144 = vector.load %arg5[%c0_44, %c0_45, %c0_46] : memref<2x8x128xf32, #tpu.memory_space<vmem>>, vector<1x8x128xf32>
    %145 = vector.shape_cast %144 : vector<1x8x128xf32> to vector<8x128xf32>
    %146 = vector.shape_cast %143 : vector<8x128xf32> to vector<1x8x128xf32>
    tpu.vector_store %arg5[%c0_44, %c0_45, %c0_46], %146 {strides = array<i32>} : memref<2x8x128xf32, #tpu.memory_space<vmem>>, vector<1x8x128xf32>,
    %147 = vector.extract_strided_slice %12 {offsets = [8, 0], sizes = [8, 4], strides = [1, 1]} : vector<16x4xf32> to vector<8x4xf32>
    %cst_47 = arith.constant dense<0xFF800000> : vector<8xf32>
    %148 = vector.multi_reduction <maximumf>, %147, %cst_47 [1] : vector<8x4xf32> to vector<8xf32>
    %149 = vector.shape_cast %148 : vector<8xf32> to vector<8x1xf32>
    %150 = vector.broadcast %149 : vector<8x1xf32> to vector<8x4xf32>
    %151 = arith.cmpf oge, %147, %150 : vector<8x4xf32>
    %cst_48 = arith.constant 4.000000e+00 : f32
    %152 = vector.broadcast %cst_48 : f32 to vector<8x4xf32>
    %153 = arith.select %151, %15, %152 : vector<8x4xi1>, vector<8x4xf32>
    %cst_49 = arith.constant dense<0x7F800000> : vector<8xf32>
    %154 = vector.multi_reduction <minimumf>, %153, %cst_49 [1] : vector<8x4xf32> to vector<8xf32>
    %155 = vector.shape_cast %154 : vector<8xf32> to vector<8x1xf32>
    %156 = vector.broadcast %155 : vector<8x1xf32> to vector<8x4xf32>
    %157 = arith.cmpf oeq, %15, %156 : vector<8x4xf32>
    %158 = arith.extui %157 : vector<8x4xi1> to vector<8x4xi32>
    %159 = arith.sitofp %158 : vector<8x4xi32> to vector<8x4xf32>
    %cst_50 = arith.constant 1.000000e+00 : f32
    %160 = vector.broadcast %cst_50 : f32 to vector<8x4xf32>
    %161 = arith.subf %160, %159 : vector<8x4xf32>
    %162 = arith.mulf %147, %161 : vector<8x4xf32>
    %cst_51 = arith.constant dense<0xFF800000> : vector<8xf32>
    %163 = vector.multi_reduction <maximumf>, %162, %cst_51 [1] : vector<8x4xf32> to vector<8xf32>
    %164 = vector.shape_cast %163 : vector<8xf32> to vector<8x1xf32>
    %165 = vector.broadcast %164 : vector<8x1xf32> to vector<8x4xf32>
    %166 = arith.cmpf oge, %162, %165 : vector<8x4xf32>
    %cst_52 = arith.constant 4.000000e+00 : f32
    %167 = vector.broadcast %cst_52 : f32 to vector<8x4xf32>
    %168 = arith.select %166, %15, %167 : vector<8x4xi1>, vector<8x4xf32>
    %cst_53 = arith.constant dense<0x7F800000> : vector<8xf32>
    %169 = vector.multi_reduction <minimumf>, %168, %cst_53 [1] : vector<8x4xf32> to vector<8xf32>
    %170 = vector.shape_cast %169 : vector<8xf32> to vector<8x1xf32>
    %171 = vector.broadcast %170 : vector<8x1xf32> to vector<8x4xf32>
    %172 = arith.cmpf oeq, %15, %171 : vector<8x4xf32>
    %173 = arith.extui %172 : vector<8x4xi1> to vector<8x4xi32>
    %174 = arith.sitofp %173 : vector<8x4xi32> to vector<8x4xf32>
    %cst_54 = arith.constant dense<0.000000e+00> : vector<4xf32>
    %175 = vector.multi_reduction <add>, %159, %cst_54 [0] : vector<8x4xf32> to vector<4xf32>
    %176 = vector.shape_cast %175 : vector<4xf32> to vector<1x4xf32>
    %cst_55 = arith.constant 8.000000e+00 : f32
    %177 = vector.broadcast %cst_55 : f32 to vector<1x4xf32>
    %178 = arith.divf %176, %177 : vector<1x4xf32>
    %cst_56 = arith.constant dense<0.000000e+00> : vector<4xf32>
    %179 = vector.multi_reduction <add>, %147, %cst_56 [0] : vector<8x4xf32> to vector<4xf32>
    %180 = vector.shape_cast %179 : vector<4xf32> to vector<1x4xf32>
    %cst_57 = arith.constant 8.000000e+00 : f32
    %181 = vector.broadcast %cst_57 : f32 to vector<1x4xf32>
    %182 = arith.divf %180, %181 : vector<1x4xf32>
    %183 = arith.mulf %182, %178 : vector<1x4xf32>
    %c1 = arith.constant 1 : index
    %c0_58 = arith.constant 0 : index
    %c0_59 = arith.constant 0 : index
    %184 = vector.load %arg7[%c1, %c0_58, %c0_59] : memref<2x1x4xf32, #tpu.memory_space<vmem>>, vector<1x1x4xf32>
    %185 = vector.shape_cast %184 : vector<1x1x4xf32> to vector<1x4xf32>
    %186 = vector.shape_cast %183 : vector<1x4xf32> to vector<1x1x4xf32>
    tpu.vector_store %arg7[%c1, %c0_58, %c0_59], %186 {strides = array<i32>} : memref<2x1x4xf32, #tpu.memory_space<vmem>>, vector<1x1x4xf32>,
    %187 = arith.addf %149, %164 : vector<8x1xf32>
    %cst_60 = arith.constant 9.99999971E-10 : f32
    %188 = vector.broadcast %cst_60 : f32 to vector<8x1xf32>
    %189 = arith.addf %187, %188 : vector<8x1xf32>
    %190 = tpu.reciprocal %189 : vector<8x1xf32> -> vector<8x1xf32>
    %191 = arith.mulf %149, %190 : vector<8x1xf32>
    %192 = arith.mulf %164, %190 : vector<8x1xf32>
    %c1_61 = arith.constant 1 : index
    %c0_62 = arith.constant 0 : index
    %c0_63 = arith.constant 0 : index
    %193 = vector.load %arg4[%c1_61, %c0_62, %c0_63] : memref<2x8x1xf32, #tpu.memory_space<vmem>>, vector<1x8x1xf32>
    %194 = vector.shape_cast %193 : vector<1x8x1xf32> to vector<8x1xf32>
    %cst_64 = arith.constant 5.000000e+00 : f32
    %195 = vector.broadcast %cst_64 : f32 to vector<8x1xf32>
    %196 = arith.mulf %192, %195 : vector<8x1xf32>
    %197 = arith.cmpf olt, %194, %196 : vector<8x1xf32>
    %198 = arith.extui %197 : vector<8x1xi1> to vector<8x1xi32>
    %199 = arith.sitofp %198 : vector<8x1xi32> to vector<8x1xf32>
    %200 = vector.broadcast %199 : vector<8x1xf32> to vector<8x4xf32>
    %201 = arith.mulf %174, %200 : vector<8x4xf32>
    %202 = tpu.concatenate %159, %201 in 1 : vector<8x4xf32>, vector<8x4xf32> -> vector<8x8xf32>
    %203 = arith.truncf %202 : vector<8x8xf32> to vector<8x8xbf16>
    %cst_65 = arith.constant dense<0.000000e+00> : vector<8x8xf32>
    %204 = tpu.matmul %13, %203, %cst_65 {dimension_numbers = #tpu.dot_dimension_numbers<[1], [0], [0], [1], [0, 0, 1, 1], [], []>} : vector<8x8xbf16>, vector<8x8xbf16>, vector<8x8xf32> -> vector<8x8xf32>
    %205 = vector.extract_strided_slice %204 {offsets = [0, 0], sizes = [8, 4], strides = [1, 1]} : vector<8x8xf32> to vector<8x4xf32>
    %206 = arith.mulf %205, %159 : vector<8x4xf32>
    %cst_66 = arith.constant 4.000000e+00 : f32
    %207 = vector.broadcast %cst_66 : f32 to vector<8x4xf32>
    %208 = arith.cmpf olt, %206, %207 : vector<8x4xf32>
    %209 = arith.extui %208 : vector<8x4xi1> to vector<8x4xi32>
    %210 = arith.sitofp %209 : vector<8x4xi32> to vector<8x4xf32>
    %211 = arith.mulf %159, %210 : vector<8x4xf32>
    %cst_67 = arith.constant dense<0.000000e+00> : vector<4xf32>
    %212 = vector.multi_reduction <add>, %211, %cst_67 [0] : vector<8x4xf32> to vector<4xf32>
    %213 = vector.shape_cast %212 : vector<4xf32> to vector<1x4xf32>
    %cst_68 = arith.constant dense<0.000000e+00> : vector<8xf32>
    %214 = vector.multi_reduction <add>, %211, %cst_68 [1] : vector<8x4xf32> to vector<8xf32>
    %215 = vector.shape_cast %214 : vector<8xf32> to vector<8x1xf32>
    %cst_69 = arith.constant dense<0.000000e+00> : vector<8xf32>
    %216 = vector.multi_reduction <add>, %206, %cst_69 [1] : vector<8x4xf32> to vector<8xf32>
    %217 = vector.shape_cast %216 : vector<8xf32> to vector<8x1xf32>
    %218 = arith.mulf %191, %215 : vector<8x1xf32>
    %219 = vector.extract_strided_slice %204 {offsets = [0, 4], sizes = [8, 4], strides = [1, 1]} : vector<8x8xf32> to vector<8x4xf32>
    %220 = vector.broadcast %213 : vector<1x4xf32> to vector<8x4xf32>
    %221 = arith.addf %219, %220 : vector<8x4xf32>
    %222 = arith.mulf %221, %201 : vector<8x4xf32>
    %cst_70 = arith.constant 4.000000e+00 : f32
    %223 = vector.broadcast %cst_70 : f32 to vector<8x4xf32>
    %224 = arith.cmpf olt, %222, %223 : vector<8x4xf32>
    %225 = arith.extui %224 : vector<8x4xi1> to vector<8x4xi32>
    %226 = arith.sitofp %225 : vector<8x4xi32> to vector<8x4xf32>
    %227 = arith.mulf %201, %226 : vector<8x4xf32>
    %cst_71 = arith.constant dense<0.000000e+00> : vector<8xf32>
    %228 = vector.multi_reduction <add>, %227, %cst_71 [1] : vector<8x4xf32> to vector<8xf32>
    %229 = vector.shape_cast %228 : vector<8xf32> to vector<8x1xf32>
    %cst_72 = arith.constant dense<0.000000e+00> : vector<8xf32>
    %230 = vector.multi_reduction <add>, %222, %cst_72 [1] : vector<8x4xf32> to vector<8xf32>
    %231 = vector.shape_cast %230 : vector<8xf32> to vector<8x1xf32>
    %232 = arith.mulf %192, %229 : vector<8x1xf32>
    %233 = vector.broadcast %22 : vector<1x128xf32> to vector<8x128xf32>
    %234 = vector.broadcast %155 : vector<8x1xf32> to vector<8x128xf32>
    %235 = arith.cmpf oeq, %233, %234 : vector<8x128xf32>
    %236 = vector.broadcast %25 : vector<1x128xf32> to vector<8x128xf32>
    %237 = vector.broadcast %217 : vector<8x1xf32> to vector<8x128xf32>
    %238 = arith.cmpf oeq, %236, %237 : vector<8x128xf32>
    %239 = arith.andi %235, %238 : vector<8x128xi1>
    %240 = vector.broadcast %22 : vector<1x128xf32> to vector<8x128xf32>
    %241 = vector.broadcast %170 : vector<8x1xf32> to vector<8x128xf32>
    %242 = arith.cmpf oeq, %240, %241 : vector<8x128xf32>
    %243 = vector.broadcast %25 : vector<1x128xf32> to vector<8x128xf32>
    %244 = vector.broadcast %231 : vector<8x1xf32> to vector<8x128xf32>
    %245 = arith.cmpf oeq, %243, %244 : vector<8x128xf32>
    %246 = arith.andi %242, %245 : vector<8x128xi1>
    %247 = arith.mulf %218, %215 : vector<8x1xf32>
    %cst_73 = arith.constant 0.000000e+00 : f32
    %248 = vector.shape_cast %247 : vector<8x1xf32> to vector<8x1xf32>
    %249 = vector.broadcast %248 : vector<8x1xf32> to vector<8x128xf32>
    %250 = vector.broadcast %cst_73 : f32 to vector<8x128xf32>
    %251 = arith.select %239, %249, %250 : vector<8x128xi1>, vector<8x128xf32>
    %252 = arith.mulf %232, %229 : vector<8x1xf32>
    %cst_74 = arith.constant 0.000000e+00 : f32
    %253 = vector.shape_cast %252 : vector<8x1xf32> to vector<8x1xf32>
    %254 = vector.broadcast %253 : vector<8x1xf32> to vector<8x128xf32>
    %255 = vector.broadcast %cst_74 : f32 to vector<8x128xf32>
    %256 = arith.select %246, %254, %255 : vector<8x128xi1>, vector<8x128xf32>
    %257 = arith.addf %251, %256 : vector<8x128xf32>
    %c1_75 = arith.constant 1 : index
    %c0_76 = arith.constant 0 : index
    %c0_77 = arith.constant 0 : index
    %258 = vector.load %arg6[%c1_75, %c0_76, %c0_77] : memref<2x8x128xf32, #tpu.memory_space<vmem>>, vector<1x8x128xf32>
    %259 = vector.shape_cast %258 : vector<1x8x128xf32> to vector<8x128xf32>
    %260 = vector.shape_cast %257 : vector<8x128xf32> to vector<1x8x128xf32>
    tpu.vector_store %arg6[%c1_75, %c0_76, %c0_77], %260 {strides = array<i32>} : memref<2x8x128xf32, #tpu.memory_space<vmem>>, vector<1x8x128xf32>,
    %cst_78 = arith.constant 0.000000e+00 : f32
    %261 = vector.broadcast %cst_78 : f32 to vector<8x128xf32>
    %262 = arith.cmpf one, %257, %261 : vector<8x128xf32>
    %263 = arith.extui %262 : vector<8x128xi1> to vector<8x128xi32>
    %264 = arith.sitofp %263 : vector<8x128xi32> to vector<8x128xf32>
    %c1_79 = arith.constant 1 : index
    %c0_80 = arith.constant 0 : index
    %c0_81 = arith.constant 0 : index
    %265 = vector.load %arg5[%c1_79, %c0_80, %c0_81] : memref<2x8x128xf32, #tpu.memory_space<vmem>>, vector<1x8x128xf32>
    %266 = vector.shape_cast %265 : vector<1x8x128xf32> to vector<8x128xf32>
    %267 = vector.shape_cast %264 : vector<8x128xf32> to vector<1x8x128xf32>
    tpu.vector_store %arg5[%c1_79, %c0_80, %c0_81], %267 {strides = array<i32>} : memref<2x8x128xf32, #tpu.memory_space<vmem>>, vector<1x8x128xf32>,
    return
  }
  func.func @transform_0(%arg0: i32) -> (i32, i32, i32) {
    %c0_i32 = arith.constant 0 : i32
    %c0_i32_0 = arith.constant 0 : i32
    %c0_i32_1 = arith.constant 0 : i32
    return %arg0, %c0_i32, %c0_i32_0 : i32, i32, i32
  }
  func.func @transform_1(%arg0: i32) -> (i32, i32) {
    %c0_i32 = arith.constant 0 : i32
    %c0_i32_0 = arith.constant 0 : i32
    %c0_i32_1 = arith.constant 0 : i32
    return %c0_i32, %c0_i32_0 : i32, i32
  }
  func.func @transform_2(%arg0: i32) -> (i32, i32) {
    %c0_i32 = arith.constant 0 : i32
    %c0_i32_0 = arith.constant 0 : i32
    %c0_i32_1 = arith.constant 0 : i32
    return %c0_i32, %c0_i32_0 : i32, i32
  }
  func.func @transform_3(%arg0: i32) -> (i32, i32, i32) {
    %c0_i32 = arith.constant 0 : i32
    %c0_i32_0 = arith.constant 0 : i32
    %c0_i32_1 = arith.constant 0 : i32
    return %arg0, %c0_i32, %c0_i32_0 : i32, i32, i32
  }
  func.func @transform_4(%arg0: i32) -> (i32, i32, i32) {
    %c0_i32 = arith.constant 0 : i32
    %c0_i32_0 = arith.constant 0 : i32
    %c0_i32_1 = arith.constant 0 : i32
    return %arg0, %c0_i32, %c0_i32_0 : i32, i32, i32
  }
  func.func @transform_5(%arg0: i32) -> (i32, i32, i32) {
    %c0_i32 = arith.constant 0 : i32
    %c0_i32_0 = arith.constant 0 : i32
    %c0_i32_1 = arith.constant 0 : i32
    return %arg0, %c0_i32, %c0_i32_0 : i32, i32, i32
  }
  func.func @transform_6(%arg0: i32) -> (i32, i32, i32) {
    %c0_i32 = arith.constant 0 : i32
    %c0_i32_0 = arith.constant 0 : i32
    %c0_i32_1 = arith.constant 0 : i32
    return %arg0, %c0_i32, %c0_i32_0 : i32, i32, i32
  }
}

</mosaic_0001>

<bundles_post_ra>
// kernel: tpu_custom_call.1
= control target key start
LH: loop header
LB: loop body
LE: loop exit
PB: predicated region body
PF: predicated region fallthrough
CT: control target
= control target key end

     0   :  { %12 = vsyncpa [#allocation3], 0  ;;  %vm29_vm0 = vcmask 261120   ;;  %s1025_s0 = inlined_call_operand.vmem [shape: f32[2,8,32], index: 0, kind: input, shape index: {}]   ;;  %s1026_s1 = inlined_call_operand.vmem [shape: f32[32,4], index: 1, kind: input, shape index: {}]   ;;  %s1027_s2 = inlined_call_operand.vmem [shape: bf16[8,8], index: 2, kind: input, shape index: {}]   ;;  %s1028_s3 = inlined_call_operand.vmem [shape: f32[2,8,1], index: 3, kind: input, shape index: {}]   ;;  %s1029_s4 = inlined_call_operand.hbm [shape: f32[2,8,128], index: 4, kind: output, shape index: {0}]   ;;  %s1030_s5 = inlined_call_operand.hbm [shape: f32[2,8,128], index: 5, kind: output, shape index: {1}]   ;;  %s1031_s6 = inlined_call_operand.hbm [shape: f32[2,1,4], index: 6, kind: output, shape index: {2}]  }
   0x1   :  { %v28_v0 = vld [vmem:[%s1026_s1 + $0x18] sm:$0xff]  ;;  %v27_v1 = vld [vmem:[%s1026_s1 + $0x10] sm:$0xff]  ;;  %v26_v2 = vld [vmem:[%s1026_s1 + $0x8] sm:$0xff] }
   0x2   :  { %v48_v3 = vand.u32 4294901760, %v28_v0  ;;  %v50_v4 = vand.u32 4294901760, %v27_v1  ;;  %v52_v5 = vand.u32 4294901760, %v26_v2  ;;  %v25_v6 = vld [vmem:[%s1026_s1] sm:$0xff]  ;;  %v24_v8 = vld [vmem:[%s1025_s0 + $0x8] sm:$0xff] }
   0x3   :  { %v23_v7 = vld [vmem:[%s1025_s0] sm:$0xff]  ;;  %v54_v9 = vand.u32 4294901760, %v25_v6  ;;  %v34_v11 = vsel %vm29_vm0, %v24_v8, 0 }
   0x4   :  { %v31_v10 = vsel %vm29_vm0, %v23_v7, 0 }
   0x5   :  { %13 = vsyncpa [#allocation5], 0  ;;  %49 = vmatpush.msra.mxu0 %v48_v3  ;;  %v86_v12 = vsub.f32 %v28_v0, %v48_v3  ;;  %v92_v13 = vsub.f32 %v27_v1, %v50_v4  ;;  %166 = vmatpush.msra.mxu3 %v48_v3  ;;  %v98_v14 = vsub.f32 %v26_v2, %v52_v5  ;;  %v56_v15 = vand.u32 4294901760, %v31_v10  ;;  %s817_s13 = smov [#allocation4]   ;;  %s650_s17 = sshll.u32 %s1030_s5, 4  ;;  %s651_s17 = int_to_ptr.hbm [resolvable:$true] %s650_s17 }
   0x6   :  { %v104_v16 = vsub.f32 %v25_v6, %v54_v9  ;;  %v64_v17 = vand.u32 4294901760, %v34_v11  ;;  %vm252_vm1 = vcmask 31744   ;;  %vm358_vm15 = vcmask 24576   ;;  %s1000_s14 = sshll.u32 %s817_s13, 4  ;;  %s818_s18 = smov [#allocation6]   ;;  %s649_s14 = int_to_ptr.vmem [resolvable:$true] %s1000_s14 }
   0x7   :  { %51 = vmatpush.msra.mxu0 %v50_v4  ;;  %132 = vmatpush.msra.mxu2 %v86_v12  ;;  %v87_v18 = vand.u32 4294901760, %v86_v12  ;;  %v57_v19 = vsub.f32 %v31_v10, %v56_v15  ;;  %v93_v20 = vand.u32 4294901760, %v92_v13  ;;  %v99_v21 = vand.u32 4294901760, %v98_v14  ;;  %s1012_s19 = sshll.u32 %s818_s18, 4  ;;  %s663_s5 = sshll.u32 %s1031_s6, 4  ;;  %s662_s19 = int_to_ptr.vmem [resolvable:$true] %s1012_s19  ;;  %s664_s5 = int_to_ptr.hbm [resolvable:$true] %s663_s5 }
   0x8   :  { %168 = vmatpush.msra.mxu3 %v50_v4  ;;  %v105_v22 = vand.u32 4294901760, %v104_v16  ;;  %v65_v23 = vsub.f32 %v34_v11, %v64_v17  ;;  %s819_s22 = smov [#allocation2]   ;;  %s637_s26 = sshll.u32 %s1029_s4, 4  ;;  %s638_s26 = int_to_ptr.hbm [resolvable:$true] %s637_s26 }
   0x9   :  { %53 = vmatpush.msra.mxu0 %v52_v5  ;;  %135 = vmatpush.msra.mxu2 %v92_v13  ;;  %v88_v24 = vsub.f32 %v86_v12, %v87_v18  ;;  %v58_v25 = vand.u32 4294901760, %v57_v19  ;;  %v94_v26 = vsub.f32 %v92_v13, %v93_v20  ;;  %v100_v27 = vsub.f32 %v98_v14, %v99_v21  ;;  %s635_s23 = sshll.u32 %s819_s22, 4  ;;  %s820_s6 = smov 128   ;;  %s636_s23 = int_to_ptr.vmem [resolvable:$true] %s635_s23 }
   0xa   :  { %170 = vmatpush.msra.mxu3 %v52_v5  ;;  %v106_v28 = vsub.f32 %v104_v16, %v105_v22  ;;  %v66_v32 = vand.u32 4294901760, %v65_v23  ;;  %s821_s27 = smov 8   ;;  %s822_s28 = smov 16  }
   0xb   :  { %55 = vmatpush.msra.mxu0 %v54_v9  ;;  %v89_v29 = vand.u32 4294901760, %v88_v24  ;;  %138 = vmatpush.msra.mxu2 %v98_v14  ;;  %v59_v30 = vsub.f32 %v57_v19, %v58_v25  ;;  %v95_v31 = vand.u32 4294901760, %v94_v26  ;;  %v101_v34 = vand.u32 4294901760, %v100_v27  ;;  %s823_s29 = smov 1  }
   0xc   :  { %172 = vmatpush.msra.mxu3 %v54_v9  ;;  %v107_v35 = vand.u32 4294901760, %v106_v28  ;;  %v67_v36 = vsub.f32 %v65_v23, %v66_v32 }
   0xd   :  { %201 = vmatpush.msrb.mxu0 %v87_v18  ;;  %90 = vmatpush.msra.mxu1 %v89_v29  ;;  %v60_v33 = vand.u32 4294901760, %v59_v30 }
   0xe   :  { %141 = vmatpush.msra.mxu2 %v104_v16  ;;  %176 = vmatmul.f32.vlgmr.msra.gmra.mxu3 %v58_v25  ;;  %v68_v37 = vand.u32 4294901760, %v67_v36 }
   0xf   :  { %144 = vmatmul.f32.vlgmr.msra.gmra.mxu2 %v57_v19  ;;  %61 = vmatmul.f32.vlgmr.msra.gmra.mxu0 %v60_v33 }
  0x10   :  { %96 = vmatpush.msra.mxu1 %v95_v31  ;;  %205 = vmatpush.msrb.mxu0 %v93_v20 }
  0x12   :  { %102 = vmatpush.msra.mxu1 %v101_v34  ;;  %209 = vmatpush.msrb.mxu0 %v99_v21  ;;  %v302_v34 = vlaneseq }
  0x14   :  { %108 = vmatpush.msra.mxu1 %v107_v35  ;;  %213 = vmatpush.msrb.mxu0 %v105_v22  ;;  %v303_v35 = vand.u32 127, %v302_v34 }
  0x15   :  { %110 = vmatmul.f32.vlgmr.msra.gmra.mxu1 %v56_v15 }
  0x16   :  { %236 = vmatpush.msrb.mxu1 %v48_v3  ;;  %182 = vmatmul.f32.gmra.mxu3 %v66_v32  ;;  %v883_v36 = vcvt.s32.f32 %v303_v35 }
  0x17   :  { %149 = vmatmul.f32.gmra.mxu2 %v65_v23  ;;  %69 = vmatmul.f32.gmra.mxu0 %v68_v37 }
  0x18   :  { %238 = vmatpush.msrb.mxu1 %v50_v4 }
  0x1a   :  { %240 = vmatpush.msrb.mxu1 %v52_v5 }
  0x1c   :  { %242 = vmatpush.msrb.mxu1 %v54_v9 }
  0x1d   :  { %114 = vmatmul.f32.gmra.mxu1 %v64_v17 }
  0x1f   :  { %215 = vmatmul.f32.vlgmr.msrb.gmra.mxu0 %v56_v15 }
  0x25   :  { %244 = vmatmul.f32.vlgmr.msrb.gmra.mxu1 %v56_v15 }
  0x27   :  { %219 = vmatmul.f32.gmra.mxu0 %v64_v17 }
  0x2d   :  { %248 = vmatmul.f32.gmra.mxu1 %v64_v17 }
  0x8c   :  { %v62_v38 = vpop.f32.mrf.mxu0 }
  0x91   :  { %v177_v43 = vpop.f32.mrf.mxu3 }
  0x92   :  { %v111_v39 = vpop.f32.mrf.mxu1  ;;  %v145_v41 = vpop.f32.mrf.mxu2 }
  0x93   :  { %v112_v42 = vadd.f32 %v111_v39, %v62_v38 }
  0x94   :  { %v70_v40 = vpop.f32.mrf.mxu0 }
  0x95   :  { %v146_v45 = vadd.f32 %v145_v41, %v112_v42 }
  0x97   :  { %v178_v47 = vadd.f32 %v177_v43, %v146_v45  ;;  %v812_v43 = vmov 8.0  }
  0x99   :  { %v183_v54 = vpop.f32.mrf.mxu3 }
  0x9a   :  { %v115_v44 = vpop.f32.mrf.mxu1  ;;  %v150_v49 = vpop.f32.mrf.mxu2 }
  0x9b   :  { %v116_v48 = vadd.f32 %v115_v44, %v70_v40 }
  0x9c   :  { %v216_v46 = vpop.f32.mrf.mxu0 }
  0x9d   :  { %v217_v50 = vadd.f32 %v216_v46, %v178_v47  ;;  %v151_v52 = vadd.f32 %v150_v49, %v116_v48 }
  0x9f   :  { %v184_v57 = vadd.f32 %v183_v54, %v151_v52  ;;  %v813_v54 = vmov 0.0  }
  0xa2   :  { %v245_v51 = vpop.f32.mrf.mxu1 }
  0xa3   :  { %v246_v53 = vadd.f32 %v245_v51, %v217_v50 }
  0xa4   :  { %v220_v56 = vpop.f32.mrf.mxu0 }
  0xa5   :  { %v253_v55 = vsel %vm252_vm1, %v246_v53, -inf  ;;  %v221_v58 = vadd.f32 %v220_v56, %v184_v57 }
  0xa6   :  { %254 = vmax.xlane.f32.xlu0 %v253_v55 }
  0xaa   :  { %v249_v59 = vpop.f32.mrf.mxu1 }
  0xab   :  { %v250_v60 = vadd.f32 %v249_v59, %v221_v58 }
  0xad   :  { %v256_v61 = vsel %vm252_vm1, %v250_v60, -inf }
  0xae   :  { %257 = vmax.xlane.f32.xlu0 %v256_v61 }
 0x119   :  { %v255_v62 = vpop.xlane.xlu0 %254 }
 0x11a   :  { %v259_v63 = vsub.f32 %v246_v53, %v255_v62 }
 0x11c   :  { %v261_v0 = vmul.f32 1.442695, %v259_v63 }
 0x11e   :  { %722 = vpow2.f32 %v261_v0 }
 0x121   :  { %v258_v1 = vpop.xlane.xlu0 %257 }
 0x122   :  { %v260_v2 = vsub.f32 %v250_v60, %v258_v1 }
 0x124   :  { %v723_v3 = vpop.eup %722  ;;  %v263_v4 = vmul.f32 1.442695, %v260_v2 }
 0x125   :  { %v265_v5 = vsel %vm252_vm1, %v723_v3, 0.0 }
 0x126   :  { %724 = vpow2.f32 %v263_v4  ;;  %266 = vadd.xlane.f32.xlu1 %v265_v5 }
 0x12c   :  { %v725_v6 = vpop.eup %724 }
 0x12d   :  { %v268_v7 = vsel %vm252_vm1, %v725_v6, 0.0 }
 0x12e   :  { %269 = vadd.xlane.f32.xlu1 %v268_v7 }
 0x199   :  { %v267_v8 = vpop.xlane.xlu1 %266 }
 0x19a   :  { %726 = vrcp.f32 %v267_v8  ;;  %v282_v13 = vand.u32 2147483648, %v267_v8  ;;  %v280_v15 = vand.u32 2147483647, %v267_v8  ;;  %vm276_vm3 = vweird.f32 %v267_v8 }
 0x19c   :  { %v283_v18 = vor.u32 1.1754944e-38, %v282_v13  ;;  %vm281_vm5 = vcmp.eq.f32.partialorder %v280_v15, 8.507059e+37 }
 0x1a0   :  { %v727_v9 = vpop.eup %726 }
 0x1a1   :  { %v272_v10 = vmul.f32 %v727_v9, %v267_v8  ;;  %v270_v11 = vpop.xlane.xlu1 %269  ;;  %vm277_vm2 = vweird.f32 %v727_v9 }
 0x1a2   :  { %728 = vrcp.f32 %v270_v11  ;;  %vm278_vm4 = vmor %vm276_vm3, %vm277_vm2  ;;  %v297_v24 = vand.u32 2147483648, %v270_v11  ;;  %v295_v26 = vand.u32 2147483647, %v270_v11  ;;  %vm291_vm7 = vweird.f32 %v270_v11 }
 0x1a3   :  { %v273_v12 = vsub.f32 1.0, %v272_v10  ;;  %730 = vrcp.f32 %v812_v43 }
 0x1a4   :  { %v298_v29 = vor.u32 1.1754944e-38, %v297_v24  ;;  %vm296_vm9 = vcmp.eq.f32.partialorder %v295_v26, 8.507059e+37 }
 0x1a5   :  { %v274_v14 = vmul.f32 %v727_v9, %v273_v12 }
 0x1a7   :  { %v275_v16 = vadd.f32 %v727_v9, %v274_v14 }
 0x1a8   :  { %v729_v17 = vpop.eup %728 }
 0x1a9   :  { %v287_v19 = vmul.f32 %v729_v17, %v270_v11  ;;  %v279_v20 = vsel %vm278_vm4, %v727_v9, %v275_v16  ;;  %vm292_vm6 = vweird.f32 %v729_v17  ;;  %v731_v46 = vpop.eup %730 }
 0x1aa   :  { %v284_v21 = vsel %vm281_vm5, %v283_v18, %v279_v20  ;;  %vm293_vm8 = vmor %vm291_vm7, %vm292_vm6  ;;  %v342_v49 = vmul.f32 8.0, %v731_v46  ;;  %vm346_vm14 = vweird.f32 %v731_v46 }
 0x1ab   :  { %v288_v22 = vsub.f32 1.0, %v287_v19  ;;  %v285_v23 = vmul.f32 %v723_v3, %v284_v21 }
 0x1ac   :  { %v343_v53 = vsub.f32 1.0, %v342_v49 }
 0x1ad   :  { %v289_v25 = vmul.f32 %v729_v17, %v288_v22  ;;  %v310_v27 = vsel %vm252_vm1, %v285_v23, -inf  ;;  %v349_v44 = vsel %vm252_vm1, %v285_v23, 0.0 }
 0x1ae   :  { %311 = vmax.xlane.f32.xlu2 %v310_v27  ;;  %v350_v45 = vrot.slane %v349_v44, 4  ;;  %v344_v62 = vmul.f32 %v731_v46, %v343_v53 }
 0x1af   :  { %v290_v28 = vadd.f32 %v729_v17, %v289_v25 }
 0x1b0   :  { %v351_v47 = vadd.f32 %v350_v45, %v349_v44  ;;  %v345_v5 = vadd.f32 %v731_v46, %v344_v62 }
 0x1b1   :  { %v294_v30 = vsel %vm293_vm8, %v729_v17, %v290_v28 }
 0x1b2   :  { %v299_v31 = vsel %vm296_vm9, %v298_v29, %v294_v30  ;;  %v352_v50 = vrot.slane %v351_v47, 2  ;;  %v347_v15 = vsel %vm346_vm14, %v731_v46, %v345_v5 }
 0x1b3   :  { %v300_v32 = vmul.f32 %v725_v6, %v299_v31 }
 0x1b4   :  { %v353_v58 = vadd.f32 %v352_v50, %v351_v47 }
 0x1b5   :  { %v475_v33 = vsel %vm252_vm1, %v300_v32, -inf  ;;  %v507_v48 = vsel %vm252_vm1, %v300_v32, 0.0 }
 0x1b6   :  { %476 = vmax.xlane.f32.xlu2 %v475_v33  ;;  %v508_v51 = vrot.slane %v507_v48, 4  ;;  %v354_v4 = vrot.slane %v353_v58, 1  ;;  %v814_v33 = vmov 0  }
 0x1b7   :  { %711 = vset.pattern.permute.xlu0 %v814_v33 }
 0x1b8   :  { %v509_v59 = vadd.f32 %v508_v51, %v507_v48  ;;  %v355_v13 = vadd.f32 %v354_v4, %v353_v58 }
 0x1ba   :  { %v510_v1 = vrot.slane %v509_v59, 2  ;;  %v356_v21 = vmul.f32 %v355_v13, %v347_v15 }
 0x1bc   :  { %v511_v10 = vadd.f32 %v510_v1, %v509_v59 }
 0x1be   :  { %v512_v22 = vrot.slane %v511_v10, 1 }
 0x1c0   :  { %v513_v26 = vadd.f32 %v512_v22, %v511_v10  ;;  %v693_v10 = vld [vmem:[%s1028_s3 + $0x8] sm:$0xff] }
 0x1c2   :  { %v514_v29 = vmul.f32 %v513_v26, %v347_v15 }
 0x221   :  { %v885_v37 = vpop.xlane.xlu2 %311 }
 0x222   :  { %vm313_vm10 = vcmp.ge.f32.partialorder %v285_v23, %v885_v37 }
 0x223   :  { %v314_v38 = vsel %vm313_vm10, %v883_v36, 4.0 }
 0x224   :  { %v315_v39 = vsel %vm252_vm1, %v314_v38, inf }
 0x225   :  { %316 = vmin.xlane.f32.xlu0 %v315_v39 }
 0x229   :  { %v890_v40 = vpop.xlane.xlu2 %476 }
 0x22a   :  { %vm478_vm11 = vcmp.ge.f32.partialorder %v300_v32, %v890_v40 }
 0x22b   :  { %v479_v41 = vsel %vm478_vm11, %v883_v36, 4.0 }
 0x22c   :  { %v480_v42 = vsel %vm252_vm1, %v479_v41, inf }
 0x22d   :  { %481 = vmin.xlane.f32.xlu1 %v480_v42 }
 0x298   :  { %v897_v52 = vpop.xlane.xlu0 %316 }
 0x299   :  { %vm318_vm12 = vcmp.eq.f32.partialorder %v883_v36, %v897_v52 }
 0x29a   :  { %v902_v55 = vsel %vm318_vm12, 1.0, %v813_v54 }
 0x29b   :  { %v334_v56 = vsel %vm252_vm1, %v902_v55, 0.0  ;;  %v321_v57 = vsub.f32 1.0, %v902_v55 }
 0x29c   :  { %v335_v60 = vrot.slane %v334_v56, 4 }
 0x29d   :  { %v322_v61 = vmul.f32 %v321_v57, %v285_v23 }
 0x29e   :  { %v336_v63 = vadd.f32 %v335_v60, %v334_v56 }
 0x29f   :  { %v323_v0 = vsel %vm252_vm1, %v322_v61, -inf }
 0x2a0   :  { %v337_v2 = vrot.slane %v336_v63, 2  ;;  %v908_v3 = vpop.xlane.xlu1 %481  ;;  %324 = vmax.xlane.f32.xlu2 %v323_v0 }
 0x2a1   :  { %vm483_vm13 = vcmp.eq.f32.partialorder %v883_v36, %v908_v3 }
 0x2a2   :  { %v338_v6 = vadd.f32 %v337_v2, %v336_v63  ;;  %v913_v7 = vsel %vm483_vm13, 1.0, %v813_v54 }
 0x2a3   :  { %v499_v8 = vsel %vm252_vm1, %v913_v7, 0.0  ;;  %v486_v9 = vsub.f32 1.0, %v913_v7 }
 0x2a4   :  { %v339_v11 = vrot.slane %v338_v6, 1  ;;  %v500_v12 = vrot.slane %v499_v8, 4 }
 0x2a5   :  { %v487_v14 = vmul.f32 %v486_v9, %v300_v32 }
 0x2a6   :  { %v340_v16 = vadd.f32 %v339_v11, %v338_v6  ;;  %v501_v17 = vadd.f32 %v500_v12, %v499_v8  ;;  %v378_v8 = vld [vmem:[%s1028_s3] sm:$0xff]  ;;  %s815_s3 = smov 4  }
 0x2a7   :  { %v488_v18 = vsel %vm252_vm1, %v487_v14, -inf }
 0x2a8   :  { %v502_v19 = vrot.slane %v501_v17, 2  ;;  %489 = vmax.xlane.f32.xlu0 %v488_v18  ;;  %v348_v20 = vmul.f32 %v347_v15, %v340_v16 }
 0x2aa   :  { %v503_v23 = vadd.f32 %v502_v19, %v501_v17  ;;  %v357_v24 = vmul.f32 %v356_v21, %v348_v20 }
 0x2ac   :  { %v504_v25 = vrot.slane %v503_v23, 1  ;;  %359 = vst.msk [vmem:[#allocation6] sm:$0x1] %vm358_vm15, %v357_v24 }
 0x2ae   :  { %v505_v27 = vadd.f32 %v504_v25, %v503_v23 }
 0x2b0   :  { %v506_v28 = vmul.f32 %v505_v27, %v347_v15 }
 0x2b2   :  { %v515_v30 = vmul.f32 %v514_v29, %v506_v28  ;;  %v301_v28 = vld [vmem:[%s1027_s2] sm:$0xf]  ;;  %s816_s2 = smov 124  }
 0x2b4   :  { %517 = vst.msk [vmem:[#allocation6 + $0x1] sm:$0x1] %vm358_vm15, %v515_v30  ;;  %vm399_vm15 = vcmask 1043456  }
 0x313   :  { %v325_v31 = vpop.xlane.xlu2 %324 }
 0x314   :  { %v360_v32 = vadd.f32 %v325_v31, %v885_v37  ;;  %vm326_vm0 = vcmp.ge.f32.partialorder %v322_v61, %v325_v31 }
 0x315   :  { %v327_v34 = vsel %vm326_vm0, %v883_v36, 4.0  ;;  %vm395_vm0 = vcmask 64512  }
 0x316   :  { %v361_v35 = vadd.f32 1e-09, %v360_v32  ;;  %v328_v38 = vsel %vm252_vm1, %v327_v34, inf }
 0x317   :  { %329 = vmin.xlane.f32.xlu1 %v328_v38 }
 0x318   :  { %732 = vrcp.f32 %v361_v35  ;;  %v373_v48 = vand.u32 2147483648, %v361_v35  ;;  %v371_v50 = vand.u32 2147483647, %v361_v35  ;;  %vm367_vm4 = vweird.f32 %v361_v35 }
 0x31a   :  { %v374_v56 = vor.u32 1.1754944e-38, %v373_v48  ;;  %vm372_vm6 = vcmp.eq.f32.partialorder %v371_v50, 8.507059e+37 }
 0x31b   :  { %v490_v39 = vpop.xlane.xlu0 %489 }
 0x31c   :  { %v518_v41 = vadd.f32 %v490_v39, %v890_v40  ;;  %vm491_vm2 = vcmp.ge.f32.partialorder %v487_v14, %v490_v39 }
 0x31d   :  { %v492_v42 = vsel %vm491_vm2, %v883_v36, 4.0 }
 0x31e   :  { %v733_v43 = vpop.eup %732  ;;  %v519_v44 = vadd.f32 1e-09, %v518_v41  ;;  %v493_v45 = vsel %vm252_vm1, %v492_v42, inf }
 0x31f   :  { %v363_v46 = vmul.f32 %v733_v43, %v361_v35  ;;  %494 = vmin.xlane.f32.xlu2 %v493_v45  ;;  %vm368_vm3 = vweird.f32 %v733_v43 }
 0x320   :  { %734 = vrcp.f32 %v519_v44  ;;  %vm369_vm5 = vmor %vm367_vm4, %vm368_vm3  ;;  %v531_v61 = vand.u32 2147483648, %v519_v44  ;;  %v529_v0 = vand.u32 2147483647, %v519_v44  ;;  %vm525_vm8 = vweird.f32 %v519_v44 }
 0x321   :  { %v364_v47 = vsub.f32 1.0, %v363_v46 }
 0x322   :  { %v532_v2 = vor.u32 1.1754944e-38, %v531_v61  ;;  %vm530_vm10 = vcmp.eq.f32.partialorder %v529_v0, 8.507059e+37 }
 0x323   :  { %v365_v49 = vmul.f32 %v733_v43, %v364_v47 }
 0x325   :  { %v366_v51 = vadd.f32 %v733_v43, %v365_v49 }
 0x326   :  { %v735_v53 = vpop.eup %734 }
 0x327   :  { %v370_v57 = vsel %vm369_vm5, %v733_v43, %v366_v51  ;;  %v521_v58 = vmul.f32 %v735_v53, %v519_v44  ;;  %vm526_vm7 = vweird.f32 %v735_v53 }
 0x328   :  { %v925_v59 = vsel %vm372_vm6, %v374_v56, %v370_v57  ;;  %vm527_vm9 = vmor %vm525_vm8, %vm526_vm7 }
 0x329   :  { %v522_v60 = vsub.f32 1.0, %v521_v58  ;;  %v928_v62 = vmul.f32 %v925_v59, %v325_v31 }
 0x32b   :  { %v523_v63 = vmul.f32 %v735_v53, %v522_v60  ;;  %v379_v4 = vmul.f32 5.0, %v928_v62 }
 0x32d   :  { %v524_v1 = vadd.f32 %v735_v53, %v523_v63  ;;  %vm380_vm11 = vcmp.lt.f32.partialorder %v378_v8, %v379_v4 }
 0x32e   :  { %v686_v12 = vsel %vm380_vm11, 1.0, %v813_v54 }
 0x32f   :  { %v528_v5 = vsel %vm527_vm9, %v735_v53, %v524_v1 }
 0x330   :  { %v931_v6 = vsel %vm530_vm10, %v532_v2, %v528_v5 }
 0x331   :  { %v937_v9 = vmul.f32 %v931_v6, %v490_v39 }
 0x333   :  { %v538_v11 = vmul.f32 5.0, %v937_v9 }
 0x335   :  { %vm539_vm12 = vcmp.lt.f32.partialorder %v693_v10, %v538_v11 }
 0x336   :  { %v694_v13 = vsel %vm539_vm12, 1.0, %v813_v54 }
 0x337   :  { %v712_v14 = vpack.i.bf16 %v694_v13, %v686_v12 }
 0x339   :  { %713 = vperm.xlu0 %711, %v712_v14   ;;  %v376_v14 = vmul.f32 %v925_v59, %v885_v37 }
 0x38a   :  { %v945_v15 = vpop.xlane.xlu1 %329 }
 0x38b   :  { %vm331_vm13 = vcmp.eq.f32.partialorder %v883_v36, %v945_v15 }
 0x38c   :  { %v685_v20 = vsel %vm331_vm13, 1.0, %v813_v54 }
 0x392   :  { %v947_v16 = vpop.xlane.xlu2 %494 }
 0x393   :  { %vm496_vm14 = vcmp.eq.f32.partialorder %v883_v36, %v947_v16 }
 0x394   :  { %v692_v21 = vsel %vm496_vm14, 1.0, %v813_v54 }
 0x3ab   :  { %v714_v17 = vpop.permute.xlu0 %713 }
 0x3ac   :  { %v716_v18 = vunpack.i.h.bf16 %v714_v17  ;;  %v715_v19 = vunpack.i.l.bf16 %v714_v17 }
 0x3ae   :  { %v955_v22 = vmul.f32 %v715_v19, %v685_v20  ;;  %v957_v23 = vmul.f32 %v716_v18, %v692_v21 }
 0x3b0   :  { %390 = vrot.lane.b32.xlu1 %v955_v22, %s815_s3  ;;  %549 = vrot.lane.b32.xlu2 %v957_v23, %s815_s3 }
 0x40a   :  { %v550_v24 = vpop.permute.xlu2 %549 }
 0x40b   :  { %v552_v25 = vsel %vm252_vm1, %v913_v7, %v550_v24 }
 0x40c   :  { %v553_v26 = vpack.c.bf16 %v552_v25, %v552_v25 }
 0x40e   :  { %v555_v27 = vsel %vm399_vm15, %v553_v26, 0 }
 0x40f   :  { %564 = vmatpush.bf16.msrb.mxu3 %v555_v27 }
 0x412   :  { %695 = vmatmul.msk.bf16.vlgmr.msrb.gmra.mxu3 %vm395_vm0, %v301_v28 }
 0x422   :  { %v391_v29 = vpop.permute.xlu1 %390 }
 0x423   :  { %v393_v30 = vsel %vm252_vm1, %v902_v55, %v391_v29 }
 0x424   :  { %v394_v31 = vpack.c.bf16 %v393_v30, %v393_v30 }
 0x426   :  { %v401_v32 = vsel %vm399_vm15, %v394_v31, 0 }
 0x427   :  { %410 = vmatpush.bf16.msrb.mxu2 %v401_v32  ;;  %v305_v32 = vadd.f32 0.5, %v883_v36 }
 0x42a   :  { %687 = vmatmul.msk.bf16.vlgmr.msrb.gmra.mxu2 %vm395_vm0, %v301_v28 }
 0x495   :  { %v566_v33 = vpop.f32.mrf.mxu3 }
 0x496   :  { %v570_v34 = vmul.f32 %v913_v7, %v566_v33 }
 0x498   :  { %vm571_vm2 = vcmp.lt.f32.partialorder %v570_v34, 4.0  ;;  %v584_v13 = vsel %vm252_vm1, %v570_v34, 0.0  ;;  %v306_v34 = vmul.f32 0.25, %v305_v32 }
 0x499   :  { %v696_v35 = vsel %vm571_vm2, 1.0, %v813_v54 }
 0x49a   :  { %v574_v38 = vmul.f32 %v696_v35, %v913_v7  ;;  %v307_v35 = vfloor.f32 %v306_v34 }
 0x49c   :  { %v575_v39 = vsel %vm252_vm1, %v574_v38, 0.0  ;;  %v308_v38 = vmul.f32 4.0, %v307_v35  ;;  %vm459_vm8 = vcmp.eq.f32.partialorder %v307_v35, %v897_v52  ;;  %vm613_vm12 = vcmp.eq.f32.partialorder %v307_v35, %v908_v3 }
 0x49d   :  { %v568_v41 = vpop.f32.mrf.mxu3  ;;  %v576_v42 = vrot.slane %v575_v39, 4  ;;  %vm616_vm13 = vcmp.eq.f32.partialorder %v307_v35, %v947_v16 }
 0x49f   :  { %v577_v43 = vadd.f32 %v576_v42, %v575_v39 }
 0x4a1   :  { %v578_v44 = vrot.slane %v577_v43, 2 }
 0x4a3   :  { %v579_v45 = vadd.f32 %v578_v44, %v577_v43  ;;  %v534_v44 = vmul.f32 %v931_v6, %v890_v40 }
 0x4a5   :  { %v580_v46 = vrot.slane %v579_v45, 1 }
 0x4a7   :  { %v581_v47 = vadd.f32 %v580_v46, %v579_v45 }
 0x4a9   :  { %589 = vrot.lane.b32.xlu1 %v581_v47, %s815_s3 }
 0x4ad   :  { %v412_v48 = vpop.f32.mrf.mxu2 }
 0x4ae   :  { %v416_v49 = vmul.f32 %v902_v55, %v412_v48 }
 0x4b0   :  { %vm417_vm3 = vcmp.lt.f32.partialorder %v416_v49, 4.0  ;;  %v430_v0 = vsel %vm252_vm1, %v416_v49, 0.0 }
 0x4b1   :  { %v688_v50 = vsel %vm417_vm3, 1.0, %v813_v54 }
 0x4b2   :  { %v420_v51 = vmul.f32 %v688_v50, %v902_v55 }
 0x4b4   :  { %v421_v7 = vsel %vm252_vm1, %v420_v51, 0.0 }
 0x4b5   :  { %v414_v53 = vpop.f32.mrf.mxu2  ;;  %v422_v56 = vrot.slane %v421_v7, 4 }
 0x4b7   :  { %v423_v57 = vadd.f32 %v422_v56, %v421_v7 }
 0x4b9   :  { %v424_v58 = vrot.slane %v423_v57, 2 }
 0x4bb   :  { %v425_v60 = vadd.f32 %v424_v58, %v423_v57 }
 0x4bd   :  { %v426_v61 = vrot.slane %v425_v60, 1 }
 0x4bf   :  { %v427_v63 = vadd.f32 %v426_v61, %v425_v60 }
 0x4c1   :  { %435 = vrot.lane.b32.xlu2 %v427_v63, %s815_s3 }
 0x4d3   :  { %431 = vadd.xlane.f32.xlu1 %v430_v0 }
 0x4ea   :  { %428 = vadd.xlane.f32.xlu2 %v421_v7 }
 0x51b   :  { %v590_v1 = vpop.permute.xlu1 %589  ;;  %v436_v2 = vpop.permute.xlu2 %435 }
 0x51c   :  { %v592_v4 = vadd.f32 %v590_v1, %v566_v33  ;;  %v438_v5 = vadd.f32 %v436_v2, %v412_v48 }
 0x51e   :  { %v593_v55 = vmul.f32 %v592_v4, %v550_v24  ;;  %v439_v8 = vmul.f32 %v438_v5, %v391_v29 }
 0x520   :  { %vm594_vm4 = vcmp.lt.f32.partialorder %v593_v55, 4.0  ;;  %vm440_vm5 = vcmp.lt.f32.partialorder %v439_v8, 4.0  ;;  %606 = vrot.lane.b32.xlu1 %v593_v55, %s816_s2  ;;  %452 = vrot.lane.b32.xlu2 %v439_v8, %s816_s2 }
 0x521   :  { %v689_v10 = vsel %vm440_vm5, 1.0, %v813_v54  ;;  %v697_v11 = vsel %vm594_vm4, 1.0, %v813_v54 }
 0x522   :  { %v717_v12 = vpack.i.bf16 %v697_v11, %v689_v10 }
 0x524   :  { %718 = vrot.lane.b32.xlu0 %v717_v12, %s816_s2 }
 0x546   :  { %v432_v27 = vpop.xlane.xlu1 %431 }
 0x549   :  { %582 = vadd.xlane.f32.xlu2 %v575_v39 }
 0x54e   :  { %585 = vadd.xlane.f32.xlu0 %v584_v13 }
 0x55d   :  { %v429_v17 = vpop.xlane.xlu2 %428 }
 0x55e   :  { %v433_v18 = vmul.f32 %v429_v17, %v376_v14 }
 0x560   :  { %v465_v19 = vmul.f32 %v433_v18, %v429_v17 }
 0x57a   :  { %v453_v20 = vpop.permute.xlu2 %452 }
 0x57b   :  { %v455_v21 = vsel %vm252_vm1, %v453_v20, 0.0 }
 0x57c   :  { %456 = vadd.xlane.f32.xlu0 %v455_v21 }
 0x592   :  { %v607_v37 = vpop.permute.xlu1 %606 }
 0x593   :  { %v609_v59 = vsel %vm252_vm1, %v607_v37, 0.0 }
 0x596   :  { %v719_v24 = vpop.permute.xlu0 %718 }
 0x597   :  { %v721_v25 = vunpack.i.h.bf16 %v719_v24  ;;  %v720_v26 = vunpack.i.l.bf16 %v719_v24 }
 0x599   :  { %v601_v28 = vmul.f32 %v721_v25, %v957_v23  ;;  %v447_v29 = vmul.f32 %v720_v26, %v955_v22  ;;  %v309_v23 = vsub.f32 %v883_v36, %v308_v38 }
 0x59b   :  { %v602_v30 = vsel %vm252_vm1, %v601_v28, 0.0  ;;  %v448_v31 = vsel %vm252_vm1, %v447_v29, 0.0  ;;  %vm460_vm6 = vcmp.eq.f32.partialorder %v309_v23, %v432_v27  ;;  %vm462_vm1 = vcmp.eq.f32.partialorder %v307_v35, %v945_v15 }
 0x59c   :  { %603 = vadd.xlane.f32.xlu1 %v602_v30  ;;  %449 = vadd.xlane.f32.xlu0 %v448_v31  ;;  %vm461_vm9 = vmand %vm459_vm8, %vm460_vm6 }
 0x59d   :  { %v466_v46 = vsel %vm461_vm9, %v465_v19, 0.0 }
 0x5a4   :  { %610 = vadd.xlane.f32.xlu0 %v609_v59 }
 0x5bc   :  { %v583_v42 = vpop.xlane.xlu2 %582 }
 0x5bd   :  { %v587_v47 = vmul.f32 %v583_v42, %v534_v44 }
 0x5c1   :  { %v586_v33 = vpop.xlane.xlu0 %585 }
 0x5c2   :  { %vm614_vm11 = vcmp.eq.f32.partialorder %v309_v23, %v586_v33 }
 0x5c3   :  { %vm1007_vm14 = vmand %vm613_vm12, %vm614_vm11 }
 0x5ef   :  { %v457_v39 = vpop.xlane.xlu0 %456 }
 0x5f0   :  { %vm463_vm7 = vcmp.eq.f32.partialorder %v309_v23, %v457_v39 }
 0x5f1   :  { %vm464_vm10 = vmand %vm462_vm1, %vm463_vm7 }
 0x60f   :  { %v450_v22 = vpop.xlane.xlu0 %449  ;;  %v604_v43 = vpop.xlane.xlu1 %603 }
 0x610   :  { %v458_v41 = vmul.f32 %v450_v22, %v928_v62  ;;  %v612_v36 = vmul.f32 %v604_v43, %v937_v9  ;;  %v619_v62 = vmul.f32 %v587_v47, %v583_v42 }
 0x612   :  { %v467_v45 = vmul.f32 %v458_v41, %v450_v22  ;;  %v621_v6 = vmul.f32 %v612_v36, %v604_v43  ;;  %v620_v3 = vsel %vm1007_vm14, %v619_v62, 0.0 }
 0x614   :  { %v468_v48 = vsel %vm464_vm10, %v467_v45, 0.0 }
 0x615   :  { %v469_v49 = vadd.f32 %v468_v48, %v466_v46 }
 0x617   :  { %470 = vst [vmem:[#allocation4] sm:$0xff] %v469_v49  ;;  %vm471_vm15 = vcmp.ne.f32.partialorder %v469_v49, 0.0  ;;  %v611_v52 = vpop.xlane.xlu0 %610 }
 0x618   :  { %v690_v9 = vsel %vm471_vm15, 1.0, %v813_v54  ;;  %vm617_vm0 = vcmp.eq.f32.partialorder %v309_v23, %v611_v52 }
 0x619   :  { %474 = vst [vmem:[#allocation2] sm:$0xff] %v690_v9  ;;  %vm618_vm2 = vmand %vm616_vm13, %vm617_vm0 }
 0x61a   :  { %v622_v15 = vsel %vm618_vm2, %v621_v6, 0.0 }
 0x61b   :  { %v623_v16 = vadd.f32 %v622_v15, %v620_v3 }
 0x61d   :  { %625 = vst [vmem:[#allocation4 + $0x8] sm:$0xff] %v623_v16  ;;  %vm626_vm3 = vcmp.ne.f32.partialorder %v623_v16, 0.0 }
 0x61e   :  { %v698_v50 = vsel %vm626_vm3, 1.0, %v813_v54  ;;  %656 = dma.vmem_to_hbm [thread:$0]  %s649_s14, 256, %s651_s17, [#allocation5], %s820_s6, %s820_s6, %s821_s27  }
 0x61f   :  { %630 = vst [vmem:[#allocation2 + $0x8] sm:$0xff] %v698_v50  ;;  %669 = dma.vmem_to_hbm [thread:$0]  %s662_s19, 32, %s664_s5, [#allocation5], %s822_s28, %s822_s28, %s823_s29  }
 0x620   :  { %643 = dma.vmem_to_hbm [thread:$0]  %s636_s23, 256, %s638_s26, [#allocation3], %s820_s6, %s820_s6, %s821_s27  }
 0x621   :  { %808 = dma.done.wait [#allocation3], 256  }
 0x622   :  { %809 = vsyncadd [#allocation3], 4294967040 }
 0x623   :  { %810 = dma.done.wait [#allocation5], 288  }
 0x624   :  { %811 = vsyncadd [#allocation5], 4294967008 }
 0x625   :  { %682 = vsyncpa [#allocation3], 1 }
 0x626   :  { %683 = vsyncpa [#allocation5], 1 }

</bundles_post_ra>
